<compile_context>
chip_gen: v6e
topology: v6e:2x2x1
jax: 0.10.0
libtpu: 0.0.40
codegen_flags: <defaults>
</compile_context>

<pallas_src>
import jax
import jax.numpy as jnp
from jax.experimental import pallas as pl
from jax.experimental.pallas import tpu as pltpu

IN_FEATURES = 120
OUT_FEATURES = 84

_MIN_BATCH_TILE = 256          # one MXU-width worth of rows; keeps tiles DMA-efficient
_MAX_BATCH_TILE_F32 = 4096     # ~2 MiB x-tile in f32 -> ~86%+ of HBM roofline regime
_MAX_BATCH_TILE_16BIT = 8192   # same byte budget for 2-byte dtypes (bf16)


def f4_kernel(x_ref, w_ref, b_ref, o_ref):
    # MXU matmul with f32 accumulation, then bias add + ReLU on the VPU in f32.
    acc = jnp.dot(x_ref[...], w_ref[...], preferred_element_type=jnp.float32)
    acc = acc + b_ref[...].astype(jnp.float32)        # (TB, 84) + (1, 84) broadcast
    o_ref[...] = jnp.maximum(acc, 0.0).astype(o_ref.dtype)


def _sublane(itemsize):
    return 16 if itemsize == 2 else 8


def _auto_batch_tile(B, itemsize):
    """Pick a batch tile: large enough to amortize per-step overhead, small enough to
    keep >= ~8 grid steps at large B (>= ~4 per TensorCore on v7x), sublane-aligned."""
    max_tile = _MAX_BATCH_TILE_16BIT if itemsize == 2 else _MAX_BATCH_TILE_F32
    if B <= _MIN_BATCH_TILE:
        return B  # single full-extent tile (always a legal block shape)
    tb = max(_MIN_BATCH_TILE, ((B // 8) // _MIN_BATCH_TILE) * _MIN_BATCH_TILE)
    tb = min(tb, max_tile)
    sub = _sublane(itemsize)
    tb = max(sub, (tb // sub) * sub)
    return tb


def f4_forward(x, w, b, *, batch_tile=None):
    """x: (B, 120), w: (120, 84), b: (84,) -> ReLU(x @ w + b) of shape (B, 84).

    Dtypes follow x (pass bf16 x/w on v6e/v7x for ~2x HBM-bandwidth savings);
    accumulation is always f32.
    """
    B = x.shape[0]
    itemsize = jnp.dtype(x.dtype).itemsize
    b2d = b.reshape(1, OUT_FEATURES)                  # keep 2-D for TPU layout

    if batch_tile is None:
        tb = _auto_batch_tile(B, itemsize)
    else:
        tb = min(batch_tile, B)
        if tb < B:
            # Enforce (8,128)/(16,128) block divisibility for user-supplied tiles.
            sub = _sublane(itemsize)
            tb = max(sub, (tb // sub) * sub)

    num_steps = pl.cdiv(B, tb)
    grid = (num_steps,)

    # Deepen pipelining on the streamed operands only when the grid actually iterates.
    stream_mode = pl.Buffered(3) if num_steps >= 3 else None

    x_bytes = itemsize
    cost = pl.CostEstimate(
        flops=2 * B * IN_FEATURES * OUT_FEATURES,
        transcendentals=0,
        bytes_accessed=(B * IN_FEATURES * x_bytes
                        + IN_FEATURES * OUT_FEATURES * jnp.dtype(w.dtype).itemsize
                        + OUT_FEATURES * jnp.dtype(b.dtype).itemsize
                        + B * OUT_FEATURES * x_bytes),
    )

    return pl.pallas_call(
        f4_kernel,
        out_shape=jax.ShapeDtypeStruct((B, OUT_FEATURES), x.dtype),
        grid_spec=pltpu.PrefetchScalarGridSpec(
            num_scalar_prefetch=0,
            grid=grid,
            in_specs=[
                # x: tiled along batch -> pipelined (3-deep when the grid iterates).
                pl.BlockSpec((tb, IN_FEATURES), lambda i: (i, 0),
                             pipeline_mode=stream_mode),
                # w, b: constant index map -> fetched once, resident in VMEM.
                pl.BlockSpec((IN_FEATURES, OUT_FEATURES), lambda i: (0, 0)),
                pl.BlockSpec((1, OUT_FEATURES), lambda i: (0, 0)),
            ],
            out_specs=pl.BlockSpec((tb, OUT_FEATURES), lambda i: (i, 0),
                                   pipeline_mode=stream_mode),
        ),
        compiler_params=pltpu.CompilerParams(
            # Batch tiles are independent -> shard across both TensorCores on v7x.
            dimension_semantics=("parallel",),
            # Conservative budget, safe on v7x (64 MiB physical) and v5e/v6e (128 MiB);
            # worst-case working set (bf16 tb=8192, 3 buffers, x+out) is ~12 MiB.
            vmem_limit_bytes=32 * 1024 * 1024,
        ),
        cost_estimate=cost,
    )(x, w, b2d)


def init_params(key):
    """Deterministic init mimicking torch.nn.Linear default (uniform +-1/sqrt(fan_in))."""
    kw, kb = jax.random.split(key)
    bound = 1.0 / jnp.sqrt(jnp.float32(IN_FEATURES))
    w = jax.random.uniform(kw, (IN_FEATURES, OUT_FEATURES),
                           minval=-bound, maxval=bound, dtype=jnp.float32)
    b = jax.random.uniform(kb, (OUT_FEATURES,),
                           minval=-bound, maxval=bound, dtype=jnp.float32)
    return w, b


if __name__ == "__main__":
    key = jax.random.PRNGKey(0)
    k_x, k_p, k_x2 = jax.random.split(key, 3)
    w, b = init_params(k_p)

    # --- Small batch (the LeNet module's realistic shape), f32 path, single tile. ---
    batch = 8
    x = jax.random.normal(k_x, (batch, IN_FEATURES), dtype=jnp.float32)
    out = f4_forward(x, w, b)
    jax.block_until_ready(out)
    ref = jnp.maximum(x @ w + b[None, :], 0.0)
    assert out.shape == (batch, OUT_FEATURES)
    assert jnp.allclose(out, ref, atol=1e-5, rtol=1e-5)

    # --- Larger batch, bf16 streaming path: exercises the multi-step grid, the
    #     Buffered(3) pipeline, sublane-16 tile rounding, and the >=8-step cap. ---
    big = 4096
    x2 = jax.random.normal(k_x2, (big, IN_FEATURES), dtype=jnp.float32).astype(jnp.bfloat16)
    w_bf = w.astype(jnp.bfloat16)
    b_bf = b.astype(jnp.bfloat16)
    out2 = f4_forward(x2, w_bf, b_bf)
    jax.block_until_ready(out2)
    ref2 = jnp.maximum(x2.astype(jnp.float32) @ w_bf.astype(jnp.float32)
                       + b_bf.astype(jnp.float32)[None, :], 0.0)
    assert out2.shape == (big, OUT_FEATURES)
    # bf16 output rounding + bf16 inputs -> loose tolerances vs. the f32 reference.
    assert jnp.allclose(out2.astype(jnp.float32), ref2, atol=2e-2, rtol=2e-2)

    # --- f32 path with a non-divisible user tile (exercises partial last tile + rounding). ---
    odd = 600
    x3 = jax.random.normal(k_x, (odd, IN_FEATURES), dtype=jnp.float32)
    out3 = f4_forward(x3, w, b, batch_tile=250)   # rounded down to 248 internally
    jax.block_until_ready(out3)
    ref3 = jnp.maximum(x3 @ w + b[None, :], 0.0)
    assert out3.shape == (odd, OUT_FEATURES)
    assert jnp.allclose(out3, ref3, atol=1e-5, rtol=1e-5)

    print("KERNEL_OK")
</pallas_src>

<mosaic_0001>
module attributes {stable_mosaic.version = 11 : i64} {
  func.func @f4_kernel(%arg0: i32, %arg1: memref<8x120xf32, #tpu.memory_space<vmem>>, %arg2: memref<120x84xf32, #tpu.memory_space<vmem>>, %arg3: memref<1x84xf32, #tpu.memory_space<vmem>>, %arg4: memref<8x84xf32, #tpu.memory_space<vmem>>) attributes {dimension_semantics = [#tpu.dimension_semantics<parallel>], iteration_bounds = array<i64: 1>, scalar_prefetch = 0 : i64, scratch_operands = 0 : i64, tpu.core_type = #tpu.core_type<tc>, window_params = [{transform_indices = @transform_0, window_bounds = array<i64: 8, 120>}, {pipeline_mode = #tpu.pipeline_mode<synchronous>, transform_indices = @transform_1, window_bounds = array<i64: 120, 84>}, {pipeline_mode = #tpu.pipeline_mode<synchronous>, transform_indices = @transform_2, window_bounds = array<i64: 1, 84>}, {transform_indices = @transform_3, window_bounds = array<i64: 8, 84>}]} {
    %c0 = arith.constant 0 : index
    %c0_0 = arith.constant 0 : index
    %0 = vector.load %arg1[%c0, %c0_0] : memref<8x120xf32, #tpu.memory_space<vmem>>, vector<8x120xf32>
    %c0_1 = arith.constant 0 : index
    %c0_2 = arith.constant 0 : index
    %1 = vector.load %arg2[%c0_1, %c0_2] : memref<120x84xf32, #tpu.memory_space<vmem>>, vector<120x84xf32>
    %cst = arith.constant dense<0.000000e+00> : vector<8x84xf32>
    %2 = tpu.matmul %0, %1, %cst {dimension_numbers = #tpu.dot_dimension_numbers<[1], [0], [0], [1], [0, 0, 1, 1], [], []>} : vector<8x120xf32>, vector<120x84xf32>, vector<8x84xf32> -> vector<8x84xf32>
    %c0_3 = arith.constant 0 : index
    %c0_4 = arith.constant 0 : index
    %3 = vector.load %arg3[%c0_3, %c0_4] : memref<1x84xf32, #tpu.memory_space<vmem>>, vector<1x84xf32>
    %4 = vector.broadcast %3 : vector<1x84xf32> to vector<8x84xf32>
    %5 = arith.addf %2, %4 : vector<8x84xf32>
    %cst_5 = arith.constant 0.000000e+00 : f32
    %6 = vector.broadcast %cst_5 : f32 to vector<8x84xf32>
    %7 = arith.maximumf %5, %6 : vector<8x84xf32>
    %c0_6 = arith.constant 0 : index
    %c0_7 = arith.constant 0 : index
    %8 = vector.load %arg4[%c0_6, %c0_7] : memref<8x84xf32, #tpu.memory_space<vmem>>, vector<8x84xf32>
    tpu.vector_store %arg4[%c0_6, %c0_7], %7 {strides = array<i32>} : memref<8x84xf32, #tpu.memory_space<vmem>>, vector<8x84xf32>,
    return
  }
  func.func @transform_0(%arg0: i32) -> (i32, i32) {
    %c0_i32 = arith.constant 0 : i32
    %c0_i32_0 = arith.constant 0 : i32
    return %arg0, %c0_i32 : i32, i32
  }
  func.func @transform_1(%arg0: i32) -> (i32, i32) {
    %c0_i32 = arith.constant 0 : i32
    %c0_i32_0 = arith.constant 0 : i32
    %c0_i32_1 = arith.constant 0 : i32
    return %c0_i32, %c0_i32_0 : i32, i32
  }
  func.func @transform_2(%arg0: i32) -> (i32, i32) {
    %c0_i32 = arith.constant 0 : i32
    %c0_i32_0 = arith.constant 0 : i32
    %c0_i32_1 = arith.constant 0 : i32
    return %c0_i32, %c0_i32_0 : i32, i32
  }
  func.func @transform_3(%arg0: i32) -> (i32, i32) {
    %c0_i32 = arith.constant 0 : i32
    %c0_i32_0 = arith.constant 0 : i32
    return %arg0, %c0_i32 : i32, i32
  }
}

</mosaic_0001>

<bundles_post_ra>
// kernel: tpu_custom_call.1
= control target key start
LH: loop header
LB: loop body
LE: loop exit
PB: predicated region body
PF: predicated region fallthrough
CT: control target
= control target key end

     0   :  { %v205_v1 = vmov 0.0   ;;  %vm206_vm0 = vmmov 0   ;;  %s282_s0 = inlined_call_operand.vmem [shape: f32[8,120], index: 0, kind: input, shape index: {}]   ;;  %s283_s1 = inlined_call_operand.vmem [shape: f32[120,84], index: 1, kind: input, shape index: {}]   ;;  %s284_s2 = inlined_call_operand.vmem [shape: f32[1,84], index: 2, kind: input, shape index: {}]   ;;  %s285_s3 = inlined_call_operand.hbm [shape: f32[8,84], index: 3, kind: output, shape index: {}]  }
   0x1   :  { %v30_v0 = vld [vmem:[%s283_s1 + $0x70] sm:$0xff]  ;;  %147 = vmatprep.subr.mxu0 %v205_v1  ;;  %v29_v2 = vld [vmem:[%s283_s1 + $0x68] sm:$0xff]  ;;  %177 = vmatprep.mubr.msk.f32.mxu0 %vm206_vm0, %v205_v1  ;;  %v28_v3 = vld [vmem:[%s283_s1 + $0x60] sm:$0xff] }
   0x2   :  { %148 = vmatpush3.msra.mxu0 %v30_v0  ;;  %v27_v4 = vld [vmem:[%s283_s1 + $0x58] sm:$0xff] }
   0x3   :  { %149 = vmatprep.subr.mxu0 %v205_v1 }
   0x4   :  { %150 = vmatpush3.msra.mxu0 %v29_v2 }
   0x5   :  { %151 = vmatprep.subr.mxu0 %v205_v1 }
   0x6   :  { %8 = vsyncpa [#allocation3], 0  ;;  %152 = vmatpush3.msra.mxu0 %v28_v3  ;;  %v26_v5 = vld [vmem:[%s283_s1 + $0x50] sm:$0xff]  ;;  %v25_v6 = vld [vmem:[%s283_s1 + $0x48] sm:$0xff]  ;;  %vm38_vm1 = vcmask 982016   ;;  %s207_s19 = smov [#allocation2]  }
   0x7   :  { %153 = vmatprep.subr.mxu0 %v205_v1  ;;  %v24_v7 = vld [vmem:[%s283_s1 + $0x40] sm:$0xff]  ;;  %v23_v8 = vld [vmem:[%s283_s1 + $0x38] sm:$0xff]  ;;  %v22_v9 = vld [vmem:[%s283_s1 + $0x30] sm:$0xff]  ;;  %s121_s20 = sshll.u32 %s207_s19, 4  ;;  %vm113_vm2 = vcmask 687104   ;;  %s122_s20 = int_to_ptr.vmem [resolvable:$true] %s121_s20 }
   0x8   :  { %154 = vmatpush3.msra.mxu0 %v27_v4  ;;  %v21_v10 = vld [vmem:[%s283_s1 + $0x28] sm:$0xff]  ;;  %v20_v11 = vld [vmem:[%s283_s1 + $0x20] sm:$0xff]  ;;  %v19_v12 = vld [vmem:[%s283_s1 + $0x18] sm:$0xff]  ;;  %p188_p1 = scmp.lt.s32.totalorder %s122_s20, %s122_s20 }
   0x9   :  { %155 = vmatprep.subr.mxu0 %v205_v1  ;;  %v18_v13 = vld [vmem:[%s283_s1 + $0x10] sm:$0xff]  ;;  %v17_v14 = vld [vmem:[%s283_s1 + $0x8] sm:$0xff]  ;;  %v16_v15 = vld [vmem:[%s283_s1] sm:$0xff]  ;;  %s183_s1 = scalar_lea.vmem %s122_s20, 128 }
   0xa   :  { %156 = vmatpush3.msra.mxu0 %v26_v5  ;;  %v15_v16 = vld [vmem:[%s282_s0] sm:$0xff]  ;;  %p184_p0 = scmp.ne.s32.totalorder %s122_s20, %s183_s1  ;;  %p189_p2 = scmp.lt.s32.totalorder %s183_s1, %s183_s1 }
   0xb   :  { %157 = vmatprep.subr.mxu0 %v205_v1  ;;  %v129_v17 = vld [vmem:[%s284_s2] ss:$0 sm:$0xff] }
   0xc   :  { %158 = vmatpush3.msra.mxu0 %v25_v6  ;;  %p190_p3 = por %p189_p2, %p188_p1 }
   0xd   :  { %159 = vmatprep.subr.mxu0 %v205_v1 }
   0xe   :  { %160 = vmatpush3.msra.mxu0 %v24_v7  ;;  %p191_p4 = pnand %p190_p3, %p184_p0 }
   0xf   :  { %161 = vmatprep.subr.mxu0 %v205_v1 }
  0x10   :  { %162 = vmatpush3.msra.mxu0 %v23_v8 }
  0x11   :  { %163 = vmatprep.subr.mxu0 %v205_v1 }
  0x12   :  { %164 = vmatpush3.msra.mxu0 %v22_v9 }
  0x13   :  { %165 = vmatprep.subr.mxu0 %v205_v1 }
  0x14   :  { %166 = vmatpush3.msra.mxu0 %v21_v10 }
  0x15   :  { %167 = vmatprep.subr.mxu0 %v205_v1 }
  0x16   :  { %168 = vmatpush3.msra.mxu0 %v20_v11 }
  0x17   :  { %169 = vmatprep.subr.mxu0 %v205_v1 }
  0x18   :  { %170 = vmatpush3.msra.mxu0 %v19_v12 }
  0x19   :  { %171 = vmatprep.subr.mxu0 %v205_v1 }
  0x1a   :  { %172 = vmatpush3.msra.mxu0 %v18_v13 }
  0x1b   :  { %173 = vmatprep.subr.mxu0 %v205_v1 }
  0x1c   :  { %174 = vmatpush3.msra.mxu0 %v17_v14 }
  0x1d   :  { %175 = vmatprep.subr.mxu0 %v205_v1 }
  0x1e   :  { %176 = vmatpush3.msra.mxu0 %v16_v15 }
  0x1f   :  { %178 = vmatmul.mubr.msk.f32.vlgmr.msra.gmra.mxu0 %vm38_vm1, %v15_v16 }
  0xdf   :  { %v108_v18 = vpop.f32.mrf.mxu0 }
  0xe0   :  { %v109_v19 = vadd.f32 %v129_v17, %v108_v18 }
  0xe1   :  { %v179_v20 = vpop.f32.mrf.mxu0 }
  0xe2   :  { %v112_v21 = vmax.f32 %v109_v19, 0.0 }
  0xe4   :  { %114 = vst.msk [vmem:[#allocation2] sm:$0xff] %vm113_vm2, %v112_v21 }
  0xe5   :  { %194 = shalt.err (!%p191_p4)
}
  0xe6   :  { %124 = dma.vmem_to_hbm [thread:$0]  %s122_s20, 128, %s285_s3, [#allocation3]  }
  0xe7   :  { %203 = dma.done.wait [#allocation3], 128  }
  0xe8   :  { %204 = vsyncadd [#allocation3], 4294967168 }
  0xe9   :  { %128 = vsyncpa [#allocation3], 1 }

</bundles_post_ra>
